<compile_context>
chip_gen: v6e
topology: v6e:2x2x1
jax: 0.10.0
libtpu: 0.0.40
codegen_flags: <defaults>
</compile_context>

<pallas_src>
import jax
import jax.numpy as jnp
import numpy as np
from jax import lax
from jax.experimental import pallas as pl
from jax.experimental.pallas import tpu as pltpu

EPS = 1e-5
OUT_LANES = 128  # lane-dense padded output width


def gnn_kernel(x_ref, adj_ref,
               wr1_ref, wo1_ref, b1_ref, g1_ref, be1_ref,
               wr2_ref, wo2_ref, b2_ref, g2_ref, be2_ref,
               wr3_ref, wo3_ref, b3_ref, g3_ref, be3_ref,
               wl1_ref, wl2_ref, wl3_ref, bl_ref,
               out_ref):
    B, N, _ = x_ref.shape
    BN = B * N
    inv_bn = 1.0 / float(BN)

    # ---- degree normalization, hoisted out of the per-layer body ----
    adj_f = adj_ref[...].astype(jnp.float32)                        # (B, N, N)
    deg = jnp.maximum(jnp.sum(adj_f, axis=-1, keepdims=True), 1.0)  # (B, N, 1)
    inv_deg = pl.reciprocal(deg, approx=True)                       # EUP slot
    adj_n = (adj_f * inv_deg).astype(jnp.bfloat16)                  # row-normalized

    def sage_bn_relu(h3d, wr_ref, wo_ref, b_ref, g_ref, be_ref):
        # h3d: (B, N, Cin) bf16
        cin = h3d.shape[-1]
        h2d = h3d.reshape(BN, cin)
        # neighbor mean aggregation (must stay batched: couples nodes via adj)
        agg = jnp.einsum('bnm,bmc->bnc', adj_n, h3d,
                         preferred_element_type=jnp.float32)        # (B, N, Cin)
        agg2d = agg.reshape(BN, cin).astype(jnp.bfloat16)
        # flattened per-node projections: two 2-D MXU matmuls, f32 accumulate
        pre = (jnp.dot(agg2d, wr_ref[...], preferred_element_type=jnp.float32)
               + jnp.dot(h2d, wo_ref[...], preferred_element_type=jnp.float32)
               + b_ref[...])                                        # (BN, Cout) f32
        h = jnp.maximum(pre, 0.0)                                   # ReLU before BN
        # one-pass BatchNorm1d stats over the BN rows (training mode, biased var)
        s1 = jnp.sum(h, axis=0, keepdims=True)
        s2 = jnp.sum(h * h, axis=0, keepdims=True)
        mean = s1 * inv_bn
        var = jnp.maximum(s2 * inv_bn - mean * mean, 0.0)
        scale = g_ref[...] * lax.rsqrt(var + EPS)                   # (1, Cout)
        shift = be_ref[...] - mean * scale
        hn = (h * scale + shift).astype(jnp.bfloat16)               # (BN, Cout)
        return hn.reshape(B, N, hn.shape[-1]), hn

    x1_3d, x1 = sage_bn_relu(x_ref[...], wr1_ref, wo1_ref, b1_ref, g1_ref, be1_ref)
    x2_3d, x2 = sage_bn_relu(x1_3d, wr2_ref, wo2_ref, b2_ref, g2_ref, be2_ref)
    _,     x3 = sage_bn_relu(x2_3d, wr3_ref, wo3_ref, b3_ref, g3_ref, be3_ref)

    # final Linear(concat([x1, x2, x3])) without the concat: three accumulated
    # matmuls into one f32 buffer; output is lane-padded to 128 (dense stores).
    y = (jnp.dot(x1, wl1_ref[...], preferred_element_type=jnp.float32)
         + jnp.dot(x2, wl2_ref[...], preferred_element_type=jnp.float32)
         + jnp.dot(x3, wl3_ref[...], preferred_element_type=jnp.float32)
         + bl_ref[...])
    out_ref[...] = jnp.maximum(y, 0.0)                              # (BN, 128)


def gnn_forward(x, adj, params):
    B, N, _ = x.shape
    H = params['wr1'].shape[1]
    out_channels = params['wl'].shape[1]
    out_pad = ((out_channels + OUT_LANES - 1) // OUT_LANES) * OUT_LANES
    bf = jnp.bfloat16

    def pad_out(w):
        return jnp.pad(w, ((0, 0), (0, out_pad - out_channels)))

    # split the final-linear weight host-side (replaces the in-kernel concat)
    wl = params['wl']
    wl1 = pad_out(wl[:H]).astype(bf)
    wl2 = pad_out(wl[H:2 * H]).astype(bf)
    wl3 = pad_out(wl[2 * H:]).astype(bf)
    bl = pad_out(params['bl']).astype(jnp.float32)

    args = (x.astype(bf), adj.astype(bf),
            params['wr1'].astype(bf), params['wo1'].astype(bf),
            params['b1'], params['g1'], params['be1'],
            params['wr2'].astype(bf), params['wo2'].astype(bf),
            params['b2'], params['g2'], params['be2'],
            params['wr3'].astype(bf), params['wo3'].astype(bf),
            params['b3'], params['g3'], params['be3'],
            wl1, wl2, wl3, bl)

    vmem_spec = pl.BlockSpec(memory_space=pltpu.MemorySpace.VMEM)
    out2d = pl.pallas_call(
        gnn_kernel,
        out_shape=jax.ShapeDtypeStruct((B * N, out_pad), jnp.float32),
        in_specs=[vmem_spec] * len(args),
        out_specs=vmem_spec,
        compiler_params=pltpu.CompilerParams(
            vmem_limit_bytes=32 * 1024 * 1024),
    )(*args)
    # slice away the lane padding and restore (B, N, out_channels)
    return out2d[:, :out_channels].reshape(B, N, out_channels)


def init_params(key, in_channels, hidden_channels, out_channels):
    """Deterministic PyTorch-style uniform(-1/sqrt(fan_in), 1/sqrt(fan_in)) init."""
    p = {}

    def linear(key, fan_in, fan_out):
        k1, k2 = jax.random.split(key)
        bound = 1.0 / np.sqrt(fan_in)
        w = jax.random.uniform(k1, (fan_in, fan_out), jnp.float32, -bound, bound)
        b = jax.random.uniform(k2, (1, fan_out), jnp.float32, -bound, bound)
        return w, b

    keys = jax.random.split(key, 7)
    # conv1: lin_rel (no bias), lin_root (bias)
    p['wr1'], _ = linear(keys[0], in_channels, hidden_channels)
    p['wo1'], p['b1'] = linear(keys[1], in_channels, hidden_channels)
    p['g1'] = jnp.ones((1, hidden_channels), jnp.float32)
    p['be1'] = jnp.zeros((1, hidden_channels), jnp.float32)
    # conv2
    p['wr2'], _ = linear(keys[2], hidden_channels, hidden_channels)
    p['wo2'], p['b2'] = linear(keys[3], hidden_channels, hidden_channels)
    p['g2'] = jnp.ones((1, hidden_channels), jnp.float32)
    p['be2'] = jnp.zeros((1, hidden_channels), jnp.float32)
    # conv3
    p['wr3'], _ = linear(keys[4], hidden_channels, out_channels)
    p['wo3'], p['b3'] = linear(keys[5], hidden_channels, out_channels)
    p['g3'] = jnp.ones((1, out_channels), jnp.float32)
    p['be3'] = jnp.zeros((1, out_channels), jnp.float32)
    # final lin: (2H + Cout) -> Cout
    p['wl'], p['bl'] = linear(keys[6], 2 * hidden_channels + out_channels,
                              out_channels)
    return p


def gnn_ref(x, adj, p):
    """Pure-JAX f32 reference for correctness checking."""
    deg = jnp.maximum(adj.sum(-1, keepdims=True), 1.0)

    def layer(h, wr, wo, b, g, be):
        agg = jnp.einsum('bnm,bmc->bnc', adj, h) / deg
        o = agg @ wr + h @ wo + b
        o = jax.nn.relu(o)
        mean = o.mean((0, 1), keepdims=True)
        var = ((o - mean) ** 2).mean((0, 1), keepdims=True)
        return g * (o - mean) / jnp.sqrt(var + EPS) + be

    x1 = layer(x, p['wr1'], p['wo1'], p['b1'], p['g1'], p['be1'])
    x2 = layer(x1, p['wr2'], p['wo2'], p['b2'], p['g2'], p['be2'])
    x3 = layer(x2, p['wr3'], p['wo3'], p['b3'], p['g3'], p['be3'])
    xc = jnp.concatenate([x1, x2, x3], axis=-1)
    return jax.nn.relu(xc @ p['wl'] + p['bl'])


if __name__ == "__main__":
    B, N = 2, 16
    in_channels, hidden_channels, out_channels = 4, 32, 16

    key = jax.random.PRNGKey(0)
    kx, kadj, kp = jax.random.split(key, 3)

    x = jax.random.normal(kx, (B, N, in_channels), jnp.float32)
    # symmetric 0/1 adjacency with self-loops
    a = (jax.random.uniform(kadj, (B, N, N)) > 0.5).astype(jnp.float32)
    adj = jnp.maximum(a, jnp.transpose(a, (0, 2, 1)))
    adj = jnp.maximum(adj, jnp.eye(N, dtype=jnp.float32)[None])

    params = init_params(kp, in_channels, hidden_channels, out_channels)

    out = gnn_forward(x, adj, params)
    jax.block_until_ready(out)

    ref = gnn_ref(x, adj, params)
    # bf16 matmul operands (f32 accumulate) -> relaxed tolerance vs f32 ref
    np.testing.assert_allclose(np.asarray(out), np.asarray(ref),
                               rtol=5e-2, atol=2e-2)
    print("KERNEL_OK")
</pallas_src>

<mosaic_0001>
module attributes {stable_mosaic.version = 11 : i64} {
  func.func @gnn_kernel(%arg0: memref<2x16x4xbf16, #tpu.memory_space<vmem>>, %arg1: memref<2x16x16xbf16, #tpu.memory_space<vmem>>, %arg2: memref<4x32xbf16, #tpu.memory_space<vmem>>, %arg3: memref<4x32xbf16, #tpu.memory_space<vmem>>, %arg4: memref<1x32xf32, #tpu.memory_space<vmem>>, %arg5: memref<1x32xf32, #tpu.memory_space<vmem>>, %arg6: memref<1x32xf32, #tpu.memory_space<vmem>>, %arg7: memref<32x32xbf16, #tpu.memory_space<vmem>>, %arg8: memref<32x32xbf16, #tpu.memory_space<vmem>>, %arg9: memref<1x32xf32, #tpu.memory_space<vmem>>, %arg10: memref<1x32xf32, #tpu.memory_space<vmem>>, %arg11: memref<1x32xf32, #tpu.memory_space<vmem>>, %arg12: memref<32x16xbf16, #tpu.memory_space<vmem>>, %arg13: memref<32x16xbf16, #tpu.memory_space<vmem>>, %arg14: memref<1x16xf32, #tpu.memory_space<vmem>>, %arg15: memref<1x16xf32, #tpu.memory_space<vmem>>, %arg16: memref<1x16xf32, #tpu.memory_space<vmem>>, %arg17: memref<32x128xbf16, #tpu.memory_space<vmem>>, %arg18: memref<32x128xbf16, #tpu.memory_space<vmem>>, %arg19: memref<16x128xbf16, #tpu.memory_space<vmem>>, %arg20: memref<1x128xf32, #tpu.memory_space<vmem>>, %arg21: memref<32x128xf32, #tpu.memory_space<vmem>>) attributes {dimension_semantics = [], scalar_prefetch = 0 : i64, scratch_operands = 0 : i64, tpu.core_type = #tpu.core_type<tc>} {
    %c0 = arith.constant 0 : index
    %c0_0 = arith.constant 0 : index
    %c0_1 = arith.constant 0 : index
    %0 = vector.load %arg1[%c0, %c0_0, %c0_1] : memref<2x16x16xbf16, #tpu.memory_space<vmem>>, vector<2x16x16xbf16>
    %1 = arith.extf %0 : vector<2x16x16xbf16> to vector<2x16x16xf32>
    %cst = arith.constant dense<0.000000e+00> : vector<2x16xf32>
    %2 = vector.multi_reduction <add>, %1, %cst [2] : vector<2x16x16xf32> to vector<2x16xf32>
    %3 = vector.shape_cast %2 : vector<2x16xf32> to vector<2x16x1xf32>
    %cst_2 = arith.constant 1.000000e+00 : f32
    %4 = vector.broadcast %cst_2 : f32 to vector<2x16x1xf32>
    %5 = arith.maximumf %3, %4 : vector<2x16x1xf32>
    %6 = tpu.reciprocal %5 {approx = true} : vector<2x16x1xf32> -> vector<2x16x1xf32>
    %7 = vector.broadcast %6 : vector<2x16x1xf32> to vector<2x16x16xf32>
    %8 = arith.mulf %1, %7 : vector<2x16x16xf32>
    %9 = arith.truncf %8 : vector<2x16x16xf32> to vector<2x16x16xbf16>
    %c0_3 = arith.constant 0 : index
    %c0_4 = arith.constant 0 : index
    %c0_5 = arith.constant 0 : index
    %10 = vector.load %arg0[%c0_3, %c0_4, %c0_5] : memref<2x16x4xbf16, #tpu.memory_space<vmem>>, vector<2x16x4xbf16>
    %11 = vector.shape_cast %10 : vector<2x16x4xbf16> to vector<32x4xbf16>
    "tpu.trace_start"() <{level = 10 : i32, message = "bnm,bmc->bnc"}> : () -> ()
    %cst_6 = arith.constant dense<0.000000e+00> : vector<2x16x4xf32>
    %12 = tpu.matmul %9, %10, %cst_6 {dimension_numbers = #tpu.dot_dimension_numbers<[2], [1], [1], [2], [0, 0, 0, 1, 1, 2], [0], [0]>} : vector<2x16x16xbf16>, vector<2x16x4xbf16>, vector<2x16x4xf32> -> vector<2x16x4xf32>
    "tpu.trace_stop"() : () -> ()
    %13 = vector.shape_cast %12 : vector<2x16x4xf32> to vector<32x4xf32>
    %14 = arith.truncf %13 : vector<32x4xf32> to vector<32x4xbf16>
    %c0_7 = arith.constant 0 : index
    %c0_8 = arith.constant 0 : index
    %15 = vector.load %arg2[%c0_7, %c0_8] : memref<4x32xbf16, #tpu.memory_space<vmem>>, vector<4x32xbf16>
    %cst_9 = arith.constant dense<0.000000e+00> : vector<32x32xf32>
    %16 = tpu.matmul %14, %15, %cst_9 {dimension_numbers = #tpu.dot_dimension_numbers<[1], [0], [0], [1], [0, 0, 1, 1], [], []>} : vector<32x4xbf16>, vector<4x32xbf16>, vector<32x32xf32> -> vector<32x32xf32>
    %c0_10 = arith.constant 0 : index
    %c0_11 = arith.constant 0 : index
    %17 = vector.load %arg3[%c0_10, %c0_11] : memref<4x32xbf16, #tpu.memory_space<vmem>>, vector<4x32xbf16>
    %cst_12 = arith.constant dense<0.000000e+00> : vector<32x32xf32>
    %18 = tpu.matmul %11, %17, %cst_12 {dimension_numbers = #tpu.dot_dimension_numbers<[1], [0], [0], [1], [0, 0, 1, 1], [], []>} : vector<32x4xbf16>, vector<4x32xbf16>, vector<32x32xf32> -> vector<32x32xf32>
    %19 = arith.addf %16, %18 : vector<32x32xf32>
    %c0_13 = arith.constant 0 : index
    %c0_14 = arith.constant 0 : index
    %20 = vector.load %arg4[%c0_13, %c0_14] : memref<1x32xf32, #tpu.memory_space<vmem>>, vector<1x32xf32>
    %21 = vector.broadcast %20 : vector<1x32xf32> to vector<32x32xf32>
    %22 = arith.addf %19, %21 : vector<32x32xf32>
    %cst_15 = arith.constant 0.000000e+00 : f32
    %23 = vector.broadcast %cst_15 : f32 to vector<32x32xf32>
    %24 = arith.maximumf %22, %23 : vector<32x32xf32>
    %cst_16 = arith.constant dense<0.000000e+00> : vector<32xf32>
    %25 = vector.multi_reduction <add>, %24, %cst_16 [0] : vector<32x32xf32> to vector<32xf32>
    %26 = vector.shape_cast %25 : vector<32xf32> to vector<1x32xf32>
    %27 = arith.mulf %24, %24 : vector<32x32xf32>
    %cst_17 = arith.constant dense<0.000000e+00> : vector<32xf32>
    %28 = vector.multi_reduction <add>, %27, %cst_17 [0] : vector<32x32xf32> to vector<32xf32>
    %29 = vector.shape_cast %28 : vector<32xf32> to vector<1x32xf32>
    %cst_18 = arith.constant 3.125000e-02 : f32
    %30 = vector.broadcast %cst_18 : f32 to vector<1x32xf32>
    %31 = arith.mulf %26, %30 : vector<1x32xf32>
    %cst_19 = arith.constant 3.125000e-02 : f32
    %32 = vector.broadcast %cst_19 : f32 to vector<1x32xf32>
    %33 = arith.mulf %29, %32 : vector<1x32xf32>
    %34 = arith.mulf %31, %31 : vector<1x32xf32>
    %35 = arith.subf %33, %34 : vector<1x32xf32>
    %cst_20 = arith.constant 0.000000e+00 : f32
    %36 = vector.broadcast %cst_20 : f32 to vector<1x32xf32>
    %37 = arith.maximumf %35, %36 : vector<1x32xf32>
    %c0_21 = arith.constant 0 : index
    %c0_22 = arith.constant 0 : index
    %38 = vector.load %arg5[%c0_21, %c0_22] : memref<1x32xf32, #tpu.memory_space<vmem>>, vector<1x32xf32>
    %cst_23 = arith.constant 9.99999974E-6 : f32
    %39 = vector.broadcast %cst_23 : f32 to vector<1x32xf32>
    %40 = arith.addf %37, %39 : vector<1x32xf32>
    %41 = math.rsqrt %40 : vector<1x32xf32>
    %42 = arith.mulf %38, %41 : vector<1x32xf32>
    %c0_24 = arith.constant 0 : index
    %c0_25 = arith.constant 0 : index
    %43 = vector.load %arg6[%c0_24, %c0_25] : memref<1x32xf32, #tpu.memory_space<vmem>>, vector<1x32xf32>
    %44 = arith.mulf %31, %42 : vector<1x32xf32>
    %45 = arith.subf %43, %44 : vector<1x32xf32>
    %46 = vector.broadcast %42 : vector<1x32xf32> to vector<32x32xf32>
    %47 = arith.mulf %24, %46 : vector<32x32xf32>
    %48 = vector.broadcast %45 : vector<1x32xf32> to vector<32x32xf32>
    %49 = arith.addf %47, %48 : vector<32x32xf32>
    %50 = arith.truncf %49 : vector<32x32xf32> to vector<32x32xbf16>
    %51 = vector.shape_cast %50 : vector<32x32xbf16> to vector<2x16x32xbf16>
    %52 = vector.shape_cast %51 : vector<2x16x32xbf16> to vector<32x32xbf16>
    "tpu.trace_start"() <{level = 10 : i32, message = "bnm,bmc->bnc"}> : () -> ()
    %cst_26 = arith.constant dense<0.000000e+00> : vector<2x16x32xf32>
    %53 = tpu.matmul %9, %51, %cst_26 {dimension_numbers = #tpu.dot_dimension_numbers<[2], [1], [1], [2], [0, 0, 0, 1, 1, 2], [0], [0]>} : vector<2x16x16xbf16>, vector<2x16x32xbf16>, vector<2x16x32xf32> -> vector<2x16x32xf32>
    "tpu.trace_stop"() : () -> ()
    %54 = vector.shape_cast %53 : vector<2x16x32xf32> to vector<32x32xf32>
    %55 = arith.truncf %54 : vector<32x32xf32> to vector<32x32xbf16>
    %c0_27 = arith.constant 0 : index
    %c0_28 = arith.constant 0 : index
    %56 = vector.load %arg7[%c0_27, %c0_28] : memref<32x32xbf16, #tpu.memory_space<vmem>>, vector<32x32xbf16>
    %cst_29 = arith.constant dense<0.000000e+00> : vector<32x32xf32>
    %57 = tpu.matmul %55, %56, %cst_29 {dimension_numbers = #tpu.dot_dimension_numbers<[1], [0], [0], [1], [0, 0, 1, 1], [], []>} : vector<32x32xbf16>, vector<32x32xbf16>, vector<32x32xf32> -> vector<32x32xf32>
    %c0_30 = arith.constant 0 : index
    %c0_31 = arith.constant 0 : index
    %58 = vector.load %arg8[%c0_30, %c0_31] : memref<32x32xbf16, #tpu.memory_space<vmem>>, vector<32x32xbf16>
    %cst_32 = arith.constant dense<0.000000e+00> : vector<32x32xf32>
    %59 = tpu.matmul %52, %58, %cst_32 {dimension_numbers = #tpu.dot_dimension_numbers<[1], [0], [0], [1], [0, 0, 1, 1], [], []>} : vector<32x32xbf16>, vector<32x32xbf16>, vector<32x32xf32> -> vector<32x32xf32>
    %60 = arith.addf %57, %59 : vector<32x32xf32>
    %c0_33 = arith.constant 0 : index
    %c0_34 = arith.constant 0 : index
    %61 = vector.load %arg9[%c0_33, %c0_34] : memref<1x32xf32, #tpu.memory_space<vmem>>, vector<1x32xf32>
    %62 = vector.broadcast %61 : vector<1x32xf32> to vector<32x32xf32>
    %63 = arith.addf %60, %62 : vector<32x32xf32>
    %cst_35 = arith.constant 0.000000e+00 : f32
    %64 = vector.broadcast %cst_35 : f32 to vector<32x32xf32>
    %65 = arith.maximumf %63, %64 : vector<32x32xf32>
    %cst_36 = arith.constant dense<0.000000e+00> : vector<32xf32>
    %66 = vector.multi_reduction <add>, %65, %cst_36 [0] : vector<32x32xf32> to vector<32xf32>
    %67 = vector.shape_cast %66 : vector<32xf32> to vector<1x32xf32>
    %68 = arith.mulf %65, %65 : vector<32x32xf32>
    %cst_37 = arith.constant dense<0.000000e+00> : vector<32xf32>
    %69 = vector.multi_reduction <add>, %68, %cst_37 [0] : vector<32x32xf32> to vector<32xf32>
    %70 = vector.shape_cast %69 : vector<32xf32> to vector<1x32xf32>
    %cst_38 = arith.constant 3.125000e-02 : f32
    %71 = vector.broadcast %cst_38 : f32 to vector<1x32xf32>
    %72 = arith.mulf %67, %71 : vector<1x32xf32>
    %cst_39 = arith.constant 3.125000e-02 : f32
    %73 = vector.broadcast %cst_39 : f32 to vector<1x32xf32>
    %74 = arith.mulf %70, %73 : vector<1x32xf32>
    %75 = arith.mulf %72, %72 : vector<1x32xf32>
    %76 = arith.subf %74, %75 : vector<1x32xf32>
    %cst_40 = arith.constant 0.000000e+00 : f32
    %77 = vector.broadcast %cst_40 : f32 to vector<1x32xf32>
    %78 = arith.maximumf %76, %77 : vector<1x32xf32>
    %c0_41 = arith.constant 0 : index
    %c0_42 = arith.constant 0 : index
    %79 = vector.load %arg10[%c0_41, %c0_42] : memref<1x32xf32, #tpu.memory_space<vmem>>, vector<1x32xf32>
    %cst_43 = arith.constant 9.99999974E-6 : f32
    %80 = vector.broadcast %cst_43 : f32 to vector<1x32xf32>
    %81 = arith.addf %78, %80 : vector<1x32xf32>
    %82 = math.rsqrt %81 : vector<1x32xf32>
    %83 = arith.mulf %79, %82 : vector<1x32xf32>
    %c0_44 = arith.constant 0 : index
    %c0_45 = arith.constant 0 : index
    %84 = vector.load %arg11[%c0_44, %c0_45] : memref<1x32xf32, #tpu.memory_space<vmem>>, vector<1x32xf32>
    %85 = arith.mulf %72, %83 : vector<1x32xf32>
    %86 = arith.subf %84, %85 : vector<1x32xf32>
    %87 = vector.broadcast %83 : vector<1x32xf32> to vector<32x32xf32>
    %88 = arith.mulf %65, %87 : vector<32x32xf32>
    %89 = vector.broadcast %86 : vector<1x32xf32> to vector<32x32xf32>
    %90 = arith.addf %88, %89 : vector<32x32xf32>
    %91 = arith.truncf %90 : vector<32x32xf32> to vector<32x32xbf16>
    %92 = vector.shape_cast %91 : vector<32x32xbf16> to vector<2x16x32xbf16>
    %93 = vector.shape_cast %92 : vector<2x16x32xbf16> to vector<32x32xbf16>
    "tpu.trace_start"() <{level = 10 : i32, message = "bnm,bmc->bnc"}> : () -> ()
    %cst_46 = arith.constant dense<0.000000e+00> : vector<2x16x32xf32>
    %94 = tpu.matmul %9, %92, %cst_46 {dimension_numbers = #tpu.dot_dimension_numbers<[2], [1], [1], [2], [0, 0, 0, 1, 1, 2], [0], [0]>} : vector<2x16x16xbf16>, vector<2x16x32xbf16>, vector<2x16x32xf32> -> vector<2x16x32xf32>
    "tpu.trace_stop"() : () -> ()
    %95 = vector.shape_cast %94 : vector<2x16x32xf32> to vector<32x32xf32>
    %96 = arith.truncf %95 : vector<32x32xf32> to vector<32x32xbf16>
    %c0_47 = arith.constant 0 : index
    %c0_48 = arith.constant 0 : index
    %97 = vector.load %arg12[%c0_47, %c0_48] : memref<32x16xbf16, #tpu.memory_space<vmem>>, vector<32x16xbf16>
    %cst_49 = arith.constant dense<0.000000e+00> : vector<32x16xf32>
    %98 = tpu.matmul %96, %97, %cst_49 {dimension_numbers = #tpu.dot_dimension_numbers<[1], [0], [0], [1], [0, 0, 1, 1], [], []>} : vector<32x32xbf16>, vector<32x16xbf16>, vector<32x16xf32> -> vector<32x16xf32>
    %c0_50 = arith.constant 0 : index
    %c0_51 = arith.constant 0 : index
    %99 = vector.load %arg13[%c0_50, %c0_51] : memref<32x16xbf16, #tpu.memory_space<vmem>>, vector<32x16xbf16>
    %cst_52 = arith.constant dense<0.000000e+00> : vector<32x16xf32>
    %100 = tpu.matmul %93, %99, %cst_52 {dimension_numbers = #tpu.dot_dimension_numbers<[1], [0], [0], [1], [0, 0, 1, 1], [], []>} : vector<32x32xbf16>, vector<32x16xbf16>, vector<32x16xf32> -> vector<32x16xf32>
    %101 = arith.addf %98, %100 : vector<32x16xf32>
    %c0_53 = arith.constant 0 : index
    %c0_54 = arith.constant 0 : index
    %102 = vector.load %arg14[%c0_53, %c0_54] : memref<1x16xf32, #tpu.memory_space<vmem>>, vector<1x16xf32>
    %103 = vector.broadcast %102 : vector<1x16xf32> to vector<32x16xf32>
    %104 = arith.addf %101, %103 : vector<32x16xf32>
    %cst_55 = arith.constant 0.000000e+00 : f32
    %105 = vector.broadcast %cst_55 : f32 to vector<32x16xf32>
    %106 = arith.maximumf %104, %105 : vector<32x16xf32>
    %cst_56 = arith.constant dense<0.000000e+00> : vector<16xf32>
    %107 = vector.multi_reduction <add>, %106, %cst_56 [0] : vector<32x16xf32> to vector<16xf32>
    %108 = vector.shape_cast %107 : vector<16xf32> to vector<1x16xf32>
    %109 = arith.mulf %106, %106 : vector<32x16xf32>
    %cst_57 = arith.constant dense<0.000000e+00> : vector<16xf32>
    %110 = vector.multi_reduction <add>, %109, %cst_57 [0] : vector<32x16xf32> to vector<16xf32>
    %111 = vector.shape_cast %110 : vector<16xf32> to vector<1x16xf32>
    %cst_58 = arith.constant 3.125000e-02 : f32
    %112 = vector.broadcast %cst_58 : f32 to vector<1x16xf32>
    %113 = arith.mulf %108, %112 : vector<1x16xf32>
    %cst_59 = arith.constant 3.125000e-02 : f32
    %114 = vector.broadcast %cst_59 : f32 to vector<1x16xf32>
    %115 = arith.mulf %111, %114 : vector<1x16xf32>
    %116 = arith.mulf %113, %113 : vector<1x16xf32>
    %117 = arith.subf %115, %116 : vector<1x16xf32>
    %cst_60 = arith.constant 0.000000e+00 : f32
    %118 = vector.broadcast %cst_60 : f32 to vector<1x16xf32>
    %119 = arith.maximumf %117, %118 : vector<1x16xf32>
    %c0_61 = arith.constant 0 : index
    %c0_62 = arith.constant 0 : index
    %120 = vector.load %arg15[%c0_61, %c0_62] : memref<1x16xf32, #tpu.memory_space<vmem>>, vector<1x16xf32>
    %cst_63 = arith.constant 9.99999974E-6 : f32
    %121 = vector.broadcast %cst_63 : f32 to vector<1x16xf32>
    %122 = arith.addf %119, %121 : vector<1x16xf32>
    %123 = math.rsqrt %122 : vector<1x16xf32>
    %124 = arith.mulf %120, %123 : vector<1x16xf32>
    %c0_64 = arith.constant 0 : index
    %c0_65 = arith.constant 0 : index
    %125 = vector.load %arg16[%c0_64, %c0_65] : memref<1x16xf32, #tpu.memory_space<vmem>>, vector<1x16xf32>
    %126 = arith.mulf %113, %124 : vector<1x16xf32>
    %127 = arith.subf %125, %126 : vector<1x16xf32>
    %128 = vector.broadcast %124 : vector<1x16xf32> to vector<32x16xf32>
    %129 = arith.mulf %106, %128 : vector<32x16xf32>
    %130 = vector.broadcast %127 : vector<1x16xf32> to vector<32x16xf32>
    %131 = arith.addf %129, %130 : vector<32x16xf32>
    %132 = arith.truncf %131 : vector<32x16xf32> to vector<32x16xbf16>
    %c0_66 = arith.constant 0 : index
    %c0_67 = arith.constant 0 : index
    %133 = vector.load %arg17[%c0_66, %c0_67] : memref<32x128xbf16, #tpu.memory_space<vmem>>, vector<32x128xbf16>
    %cst_68 = arith.constant dense<0.000000e+00> : vector<32x128xf32>
    %134 = tpu.matmul %50, %133, %cst_68 {dimension_numbers = #tpu.dot_dimension_numbers<[1], [0], [0], [1], [0, 0, 1, 1], [], []>} : vector<32x32xbf16>, vector<32x128xbf16>, vector<32x128xf32> -> vector<32x128xf32>
    %c0_69 = arith.constant 0 : index
    %c0_70 = arith.constant 0 : index
    %135 = vector.load %arg18[%c0_69, %c0_70] : memref<32x128xbf16, #tpu.memory_space<vmem>>, vector<32x128xbf16>
    %cst_71 = arith.constant dense<0.000000e+00> : vector<32x128xf32>
    %136 = tpu.matmul %91, %135, %cst_71 {dimension_numbers = #tpu.dot_dimension_numbers<[1], [0], [0], [1], [0, 0, 1, 1], [], []>} : vector<32x32xbf16>, vector<32x128xbf16>, vector<32x128xf32> -> vector<32x128xf32>
    %137 = arith.addf %134, %136 : vector<32x128xf32>
    %c0_72 = arith.constant 0 : index
    %c0_73 = arith.constant 0 : index
    %138 = vector.load %arg19[%c0_72, %c0_73] : memref<16x128xbf16, #tpu.memory_space<vmem>>, vector<16x128xbf16>
    %cst_74 = arith.constant dense<0.000000e+00> : vector<32x128xf32>
    %139 = tpu.matmul %132, %138, %cst_74 {dimension_numbers = #tpu.dot_dimension_numbers<[1], [0], [0], [1], [0, 0, 1, 1], [], []>} : vector<32x16xbf16>, vector<16x128xbf16>, vector<32x128xf32> -> vector<32x128xf32>
    %140 = arith.addf %137, %139 : vector<32x128xf32>
    %c0_75 = arith.constant 0 : index
    %c0_76 = arith.constant 0 : index
    %141 = vector.load %arg20[%c0_75, %c0_76] : memref<1x128xf32, #tpu.memory_space<vmem>>, vector<1x128xf32>
    %142 = vector.broadcast %141 : vector<1x128xf32> to vector<32x128xf32>
    %143 = arith.addf %140, %142 : vector<32x128xf32>
    %cst_77 = arith.constant 0.000000e+00 : f32
    %144 = vector.broadcast %cst_77 : f32 to vector<32x128xf32>
    %145 = arith.maximumf %143, %144 : vector<32x128xf32>
    %c0_78 = arith.constant 0 : index
    %c0_79 = arith.constant 0 : index
    %146 = vector.load %arg21[%c0_78, %c0_79] : memref<32x128xf32, #tpu.memory_space<vmem>>, vector<32x128xf32>
    tpu.vector_store %arg21[%c0_78, %c0_79], %145 {strides = array<i32>} : memref<32x128xf32, #tpu.memory_space<vmem>>, vector<32x128xf32>,
    return
  }
}

</mosaic_0001>

<bundles_post_ra>
// kernel: tpu_custom_call.1
= control target key start
LH: loop header
LB: loop body
LE: loop exit
PB: predicated region body
PF: predicated region fallthrough
CT: control target
= control target key end

     0   :  { %s2101_s0 = inlined_call_operand.vmem [shape: bf16[2,16,4], index: 0, kind: input, shape index: {}]   ;;  %s2102_s1 = inlined_call_operand.vmem [shape: bf16[2,16,16], index: 1, kind: input, shape index: {}]   ;;  %s2103_s2 = inlined_call_operand.hbm [shape: bf16[4,32], index: 2, kind: input, shape index: {}]   ;;  %s2104_s3 = inlined_call_operand.hbm [shape: bf16[4,32], index: 3, kind: input, shape index: {}]   ;;  %s2105_s4 = inlined_call_operand.hbm [shape: f32[1,32], index: 4, kind: input, shape index: {}]   ;;  %s2106_s5 = inlined_call_operand.hbm [shape: f32[1,32], index: 5, kind: input, shape index: {}]   ;;  %s2107_s6 = inlined_call_operand.hbm [shape: f32[1,32], index: 6, kind: input, shape index: {}]   ;;  %s2108_s7 = inlined_call_operand.vmem [shape: bf16[32,32], index: 7, kind: input, shape index: {}]   ;;  %s2109_s8 = inlined_call_operand.vmem [shape: bf16[32,32], index: 8, kind: input, shape index: {}]   ;;  %s2110_s9 = inlined_call_operand.hbm [shape: f32[1,32], index: 9, kind: input, shape index: {}]   ;;  %s2111_s10 = inlined_call_operand.hbm [shape: f32[1,32], index: 10, kind: input, shape index: {}]   ;;  %s2112_s11 = inlined_call_operand.hbm [shape: f32[1,32], index: 11, kind: input, shape index: {}]   ;;  %s2113_s12 = inlined_call_operand.vmem [shape: bf16[32,16], index: 12, kind: input, shape index: {}]   ;;  %s2114_s13 = inlined_call_operand.vmem [shape: bf16[32,16], index: 13, kind: input, shape index: {}]   ;;  %s2115_s14 = inlined_call_operand.vmem [shape: f32[1,16], index: 14, kind: input, shape index: {}]   ;;  %s2116_s15 = inlined_call_operand.vmem [shape: f32[1,16], index: 15, kind: input, shape index: {}]   ;;  %s2117_s16 = inlined_call_operand.vmem [shape: f32[1,16], index: 16, kind: input, shape index: {}]   ;;  %s2118_s17 = inlined_call_operand.vmem [shape: bf16[32,128], index: 17, kind: input, shape index: {}]   ;;  %s2119_s18 = inlined_call_operand.vmem [shape: bf16[32,128], index: 18, kind: input, shape index: {}]   ;;  %s2120_s19 = inlined_call_operand.vmem [shape: bf16[16,128], index: 19, kind: input, shape index: {}]   ;;  %s2121_s20 = inlined_call_operand.vmem [shape: f32[1,128], index: 20, kind: input, shape index: {}]   ;;  %s2122_s21 = inlined_call_operand.hbm [shape: f32[32,128], index: 21, kind: output, shape index: {}]  }
   0x1   :  { %2125 = sst [smem:[#allocation23_spill]] %s2101_s0 }
   0x2   :  { %2126 = sst [smem:[#allocation24_spill]] %s2102_s1 }
   0x3   :  { %2127 = sst [smem:[#allocation25_spill]] %s2103_s2 }
   0x4   :  { %2128 = sst [smem:[#allocation26_spill]] %s2104_s3 }
   0x5   :  { %2129 = sst [smem:[#allocation27_spill]] %s2105_s4 }
   0x6   :  { %2130 = sst [smem:[#allocation28_spill]] %s2106_s5 }
   0x7   :  { %26 = vsyncpa [#allocation3], 0 }
   0x8   :  { %27 = vsyncpa [#allocation6], 0 }
   0x9   :  { %28 = vsyncpa [#allocation9], 0 }
   0xa   :  { %29 = vsyncpa [#allocation12], 0 }
   0xb   :  { %30 = vsyncpa [#allocation15], 0 }
   0xc   :  { %31 = vsyncpa [#allocation4], 0  ;;  %s1786_s2 = smov [#allocation5]   ;;  %s1787_s26 = smov [#allocation8]  }
   0xd   :  { %s52_s25 = sshll.u32 %s1786_s2, 4  ;;  %s72_s27 = sshll.u32 %s1787_s26, 4  ;;  %s53_s25 = int_to_ptr.vmem [resolvable:$true] %s52_s25  ;;  %s73_s27 = int_to_ptr.vmem [resolvable:$true] %s72_s27 }
   0xe   :  { %s1602_s3 = scalar_lea.vmem %s53_s25, 32  ;;  %p1607_p1 = scmp.lt.s32.totalorder %s53_s25, %s53_s25 }
   0xf   :  { %p1603_p0 = scmp.ne.s32.totalorder %s53_s25, %s1602_s3  ;;  %p1608_p2 = scmp.lt.s32.totalorder %s1602_s3, %s1602_s3 }
  0x11   :  { %p1609_p3 = por %p1608_p2, %p1607_p1 }
  0x13   :  { %p1610_p4 = pnand %p1609_p3, %p1603_p0 }
  0x15   :  { %1613 = shalt.err (!%p1610_p4)
}
  0x16   :  { %s2131_s0 = sld [smem:[#allocation26_spill]]  ;;  %s1622_s4 = scalar_lea.vmem %s73_s27, 16 }
  0x17   :  { %p1623_p5 = scmp.ne.s32.totalorder %s73_s27, %s1622_s4  ;;  %s1626_s30 = scalar_lea.vmem %s73_s27, 32 }
  0x18   :  { %p1627_p6 = scmp.lt.s32.totalorder %s73_s27, %s73_s27  ;;  %p1628_p7 = scmp.lt.s32.totalorder %s1626_s30, %s1622_s4 }
  0x1a   :  { %p1629_p8 = por %p1628_p7, %p1627_p6 }
  0x1c   :  { %55 = dma.hbm_to_vmem [thread:$0]  %s2131_s0, 32, %s53_s25, [#allocation6]  }
  0x1d   :  { %p1630_p9 = pnand %p1629_p8, %p1623_p5 }
  0x1f   :  { %1633 = shalt.err (!%p1630_p9)
}
  0x20   :  { %s2132_s23 = sld [smem:[#allocation28_spill]]  ;;  %s1788_s1 = smov [#allocation11]  }
  0x21   :  { %s96_s24 = sshll.u32 %s1788_s1, 4  ;;  %s1789_s2 = smov [#allocation2]   ;;  %s97_s24 = int_to_ptr.vmem [resolvable:$true] %s96_s24 }
  0x22   :  { %s42_s26 = sshll.u32 %s1789_s2, 4  ;;  %s1642_s3 = scalar_lea.vmem %s97_s24, 16  ;;  %s43_s26 = int_to_ptr.vmem [resolvable:$true] %s42_s26 }
  0x23   :  { %p1643_p10 = scmp.ne.s32.totalorder %s97_s24, %s1642_s3  ;;  %s1646_s25 = scalar_lea.vmem %s97_s24, 32 }
  0x24   :  { %p1647_p11 = scmp.lt.s32.totalorder %s97_s24, %s97_s24  ;;  %p1648_p12 = scmp.lt.s32.totalorder %s1646_s25, %s1642_s3 }
  0x26   :  { %75 = dma.hbm_to_vmem [thread:$0]  %s2132_s23, 16, %s73_s27, [#allocation9]  }
  0x27   :  { %p1649_p13 = por %p1648_p12, %p1647_p11 }
  0x29   :  { %p1650_p0 = pnand %p1649_p13, %p1643_p10 }
  0x2b   :  { %1653 = shalt.err (!%p1650_p0)
}
  0x2c   :  { %99 = dma.hbm_to_vmem [thread:$0]  %s2110_s9, 16, %s97_s24, [#allocation12]  }
  0x2d   :  { %s1662_s0 = scalar_lea.vmem %s43_s26, 32  ;;  %p1667_p2 = scmp.lt.s32.totalorder %s43_s26, %s43_s26 }
  0x2e   :  { %p1663_p1 = scmp.ne.s32.totalorder %s43_s26, %s1662_s0  ;;  %p1668_p3 = scmp.lt.s32.totalorder %s1662_s0, %s1662_s0 }
  0x30   :  { %p1669_p4 = por %p1668_p3, %p1667_p2 }
  0x32   :  { %p1670_p5 = pnand %p1669_p4, %p1663_p1 }
  0x34   :  { %1673 = shalt.err (!%p1670_p5)
}
  0x35   :  { %s2133_s30 = sld [smem:[#allocation25_spill]]  ;;  %s1790_s5 = smov [#allocation7]  }
  0x36   :  { %s62_s22 = sshll.u32 %s1790_s5, 4  ;;  %s1791_s23 = smov [#allocation10]   ;;  %s63_s22 = int_to_ptr.vmem [resolvable:$true] %s62_s22 }
  0x37   :  { %s82_s1 = sshll.u32 %s1791_s23, 4  ;;  %s1682_s2 = scalar_lea.vmem %s63_s22, 16  ;;  %s83_s1 = int_to_ptr.vmem [resolvable:$true] %s82_s1 }
  0x38   :  { %p1683_p6 = scmp.ne.s32.totalorder %s63_s22, %s1682_s2  ;;  %s1686_s9 = scalar_lea.vmem %s63_s22, 32 }
  0x39   :  { %p1687_p7 = scmp.lt.s32.totalorder %s63_s22, %s63_s22  ;;  %p1688_p8 = scmp.lt.s32.totalorder %s1686_s9, %s1682_s2 }
  0x3b   :  { %45 = dma.hbm_to_vmem [thread:$0]  %s2133_s30, 32, %s43_s26, [#allocation3]  }
  0x3c   :  { %p1689_p9 = por %p1688_p8, %p1687_p7 }
  0x3e   :  { %p1690_p10 = pnand %p1689_p9, %p1683_p6 }
  0x40   :  { %1693 = shalt.err (!%p1690_p10)
}
  0x41   :  { %s2134_s25 = sld [smem:[#allocation27_spill]]  ;;  %s1702_s28 = scalar_lea.vmem %s83_s1, 16 }
  0x42   :  { %p1703_p11 = scmp.ne.s32.totalorder %s83_s1, %s1702_s28  ;;  %s1706_s26 = scalar_lea.vmem %s83_s1, 32 }
  0x43   :  { %p1707_p12 = scmp.lt.s32.totalorder %s83_s1, %s83_s1  ;;  %p1708_p13 = scmp.lt.s32.totalorder %s1706_s26, %s1702_s28 }
  0x45   :  { %p1709_p0 = por %p1708_p13, %p1707_p12 }
  0x47   :  { %65 = dma.hbm_to_vmem [thread:$0]  %s2134_s25, 16, %s63_s22, [#allocation6]  }
  0x48   :  { %p1710_p1 = pnand %p1709_p0, %p1703_p11 }
  0x4a   :  { %1713 = shalt.err (!%p1710_p1)
}
  0x4b   :  { %85 = dma.hbm_to_vmem [thread:$0]  %s2107_s6, 16, %s83_s1, [#allocation9]  }
  0x4c   :  { %s1792_s27 = smov [#allocation13]   ;;  %s1793_s30 = smov [#allocation14]  }
  0x4d   :  { %s106_s4 = sshll.u32 %s1792_s27, 4  ;;  %s116_s5 = sshll.u32 %s1793_s30, 4  ;;  %s107_s4 = int_to_ptr.vmem [resolvable:$true] %s106_s4  ;;  %s117_s5 = int_to_ptr.vmem [resolvable:$true] %s116_s5 }
  0x4e   :  { %s1722_s23 = scalar_lea.vmem %s107_s4, 16  ;;  %s1726_s22 = scalar_lea.vmem %s107_s4, 32 }
  0x4f   :  { %p1723_p2 = scmp.ne.s32.totalorder %s107_s4, %s1722_s23  ;;  %p1727_p3 = scmp.lt.s32.totalorder %s107_s4, %s107_s4 }
  0x50   :  { %p1728_p4 = scmp.lt.s32.totalorder %s1726_s22, %s1722_s23 }
  0x52   :  { %p1729_p5 = por %p1728_p4, %p1727_p3 }
  0x54   :  { %p1730_p6 = pnand %p1729_p5, %p1723_p2 }
  0x56   :  { %1733 = shalt.err (!%p1730_p6)
}
  0x57   :  { %109 = dma.hbm_to_vmem [thread:$0]  %s2111_s10, 16, %s107_s4, [#allocation12]  }
  0x58   :  { %s1742_s24 = scalar_lea.vmem %s117_s5, 16  ;;  %s1746_s6 = scalar_lea.vmem %s117_s5, 32 }
  0x59   :  { %p1743_p7 = scmp.ne.s32.totalorder %s117_s5, %s1742_s24  ;;  %p1747_p8 = scmp.lt.s32.totalorder %s117_s5, %s117_s5 }
  0x5a   :  { %p1748_p9 = scmp.lt.s32.totalorder %s1746_s6, %s1742_s24 }
  0x5c   :  { %p1749_p10 = por %p1748_p9, %p1747_p8 }
  0x5e   :  { %p1750_p11 = pnand %p1749_p10, %p1743_p7 }
  0x60   :  { %1753 = shalt.err (!%p1750_p11)
}
  0x61   :  { %119 = dma.hbm_to_vmem [thread:$0]  %s2112_s11, 16, %s117_s5, [#allocation15]  }
  0x62   :  { %1774 = dma.done.wait [#allocation3], 32  }
  0x63   :  { %1775 = vsyncadd [#allocation3], 4294967264 }
  0x64   :  { %1776 = dma.done.wait [#allocation6], 48  }
  0x65   :  { %1777 = vsyncadd [#allocation6], 4294967248 }
  0x66   :  { %1778 = dma.done.wait [#allocation9], 32  }
  0x67   :  { %1779 = vsyncadd [#allocation9], 4294967264 }
  0x68   :  { %1780 = dma.done.wait [#allocation12], 32  }
  0x69   :  { %1781 = vsyncadd [#allocation12], 4294967264 }
  0x6a   :  { %1782 = dma.done.wait [#allocation15], 16  }
  0x6b   :  { %1783 = vsyncadd [#allocation15], 4294967280  ;;  %s2135_s28 = sld [smem:[#allocation24_spill]]  ;;  %vm171_vm0 = vcmask 130048   ;;  %v1794_v12 = vmov 0.0   ;;  %vm1795_vm1 = vmmov 0  }
  0x6c   :  { %s2136_s27 = sld [smem:[#allocation23_spill]]  ;;  %1448 = vmatprep.subr.bf16.mxu0 %v1794_v12  ;;  %1454 = vmatprep.subr.bf16.mxu1 %v1794_v12  ;;  %v305_v13 = vld [vmem:[#allocation5] sm:$0x3]  ;;  %vm313_vm2 = vcmask 1041408   ;;  %vm306_vm3 = vcmask 31744   ;;  %vm439_vm4 = vcmask 261120  }
  0x6d   :  { %1450 = vmatprep.mubr.msk.bf16.mxu0 %vm1795_vm1, %v1794_v12  ;;  %1456 = vmatprep.mubr.msk.bf16.mxu1 %vm1795_vm1, %v1794_v12  ;;  %v315_v32 = vsel %vm313_vm2, %v305_v13, 0  ;;  %v304_v33 = vld [vmem:[#allocation2] sm:$0x3]  ;;  %v1359_v51 = vld [vmem:[#allocation7] ss:$0 sm:$0xff]  ;;  %s1796_s9 = smov [#allocation16]  }
  0x6e   :  { %v373_v34 = vsel %vm313_vm2, %v304_v33, 0  ;;  %s1335_s24 = sshll.u32 %s1796_s9, 4  ;;  %s1336_s24 = int_to_ptr.vmem [resolvable:$true] %s1335_s24 }
  0x6f   :  { %p1759_p13 = scmp.lt.s32.totalorder %s1336_s24, %s1336_s24 }
  0x71   :  { %v1402_v0 = vld [vmem:[%s2135_s28 + $0x8] sm:$0xff]   ;;  %v1395_v1 = vld [vmem:[%s2135_s28] sm:$0xff]  }
  0x72   :  { %v1400_v2 = vunpack.c.l.bf16 %v1402_v0  ;;  %v1396_v3 = vunpack.c.l.bf16 %v1395_v1  ;;  %v1401_v4 = vunpack.c.h.bf16 %v1402_v0  ;;  %v1397_v5 = vunpack.c.h.bf16 %v1395_v1  ;;  %v1565_v10 = vld [vmem:[%s2136_s27] sm:$0xff]   ;;  %v1566_v11 = vld [vmem:[%s2136_s27 + $0x8] sm:$0xff]  }
  0x73   :  { %1449 = vmatpush3.bf16.msra.mxu0 %v1565_v10  ;;  %1455 = vmatpush3.bf16.msra.mxu1 %v1566_v11 }
  0x74   :  { %v178_v6 = vsel %vm171_vm0, %v1400_v2, 0.0  ;;  %v172_v7 = vsel %vm171_vm0, %v1396_v3, 0.0  ;;  %v181_v8 = vsel %vm171_vm0, %v1401_v4, 0.0  ;;  %v175_v9 = vsel %vm171_vm0, %v1397_v5, 0.0  ;;  %1550 = vmatprep.subr.msk.bf16.mxu0 %vm313_vm2, %v305_v13  ;;  %1551 = vmatprep.subr.msk.bf16.mxu1 %vm313_vm2, %v304_v33 }
  0x75   :  { %179 = vadd.xlane.f32.xlu1 %v178_v6  ;;  %173 = vadd.xlane.f32.xlu0 %v172_v7 }
  0x79   :  { %182 = vadd.xlane.f32.xlu1 %v181_v8  ;;  %176 = vadd.xlane.f32.xlu0 %v175_v9 }
  0xfe   :  { %v180_v14 = vpop.xlane.xlu1 %179  ;;  %v174_v15 = vpop.xlane.xlu0 %173 }
  0xff   :  { %v186_v16 = vmax.f32 %v180_v14, 1.0  ;;  %v184_v17 = vmax.f32 %v174_v15, 1.0 }
 0x101   :  { %1580 = vrcp.f32 %v186_v16 }
 0x102   :  { %v183_v18 = vpop.xlane.xlu1 %182  ;;  %v177_v19 = vpop.xlane.xlu0 %176  ;;  %1582 = vrcp.f32 %v184_v17 }
 0x103   :  { %v187_v20 = vmax.f32 %v183_v18, 1.0  ;;  %v185_v21 = vmax.f32 %v177_v19, 1.0 }
 0x105   :  { %1584 = vrcp.f32 %v187_v20 }
 0x106   :  { %1586 = vrcp.f32 %v185_v21 }
 0x10e   :  { %v1581_v22 = vpop.eup %1580 }
 0x10f   :  { %v1583_v23 = vpop.eup %1582  ;;  %v194_v26 = vmul.f32 %v1581_v22, %v1400_v2 }
 0x110   :  { %v192_v28 = vmul.f32 %v1583_v23, %v1396_v3 }
 0x112   :  { %v1585_v24 = vpop.eup %1584 }
 0x113   :  { %v1587_v25 = vpop.eup %1586  ;;  %v195_v27 = vmul.f32 %v1585_v24, %v1401_v4 }
 0x114   :  { %v193_v29 = vmul.f32 %v1587_v25, %v1397_v5 }
 0x115   :  { %v1956_v30 = vpack.c.bf16 %v195_v27, %v194_v26 }
 0x116   :  { %v1958_v31 = vpack.c.bf16 %v193_v29, %v192_v28 }
 0x117   :  { %1457 = vmatmul.mubr.msk.bf16.vlgmr.msra.gmra.mxu1 %vm171_vm0, %v1956_v30 }
 0x118   :  { %1451 = vmatmul.mubr.msk.bf16.vlgmr.msra.gmra.mxu0 %vm171_vm0, %v1958_v31  ;;  %1467 = vmatpush3.bf16.msra.mxu1 %v373_v34 }
 0x119   :  { %1461 = vmatpush3.bf16.msra.mxu0 %v315_v32  ;;  %1462 = vmatprep.mubr.msk.bf16.mxu0 %vm306_vm3, %v1565_v10 }
 0x11a   :  { %1472 = vmatprep.subr.bf16.mxu0 %v1794_v12  ;;  %1478 = vmatprep.subr.bf16.mxu1 %v1794_v12 }
 0x120   :  { %1463 = vmatmul.mubr.msk.bf16.vlgmr.msra.gmra.mxu0 %vm306_vm3, %v1566_v11 }
 0x121   :  { %1474 = vmatprep.mubr.msk.bf16.mxu0 %vm1795_vm1, %v1794_v12 }
 0x1d7   :  { %v295_v35 = vpop.f32.mrf.mxu1 }
 0x1d8   :  { %v245_v36 = vpop.f32.mrf.mxu0 }
 0x1d9   :  { %v1458_v37 = vpop.f32.mrf.mxu1 }
 0x1da   :  { %v1452_v38 = vpop.f32.mrf.mxu0 }
 0x1db   :  { %v298_v39 = vpop.f32.mrf.mxu1 }
 0x1dc   :  { %v248_v40 = vpop.f32.mrf.mxu0  ;;  %v303_v41 = vpack.c.bf16 %v298_v39, %v295_v35 }
 0x1dd   :  { %v302_v42 = vpack.c.bf16 %v248_v40, %v245_v36  ;;  %v1459_v43 = vpop.f32.mrf.mxu1 }
 0x1de   :  { %v1453_v44 = vpop.f32.mrf.mxu0  ;;  %v475_v43 = vld [vmem:[#allocation8] sm:$0x1] }
 0x1df   :  { %1468 = vmatprep.mubr.msk.bf16.mxu1 %vm306_vm3, %v302_v42 }
 0x1e0   :  { %1469 = vmatmul.mubr.msk.bf16.vlgmr.msra.gmra.mxu1 %vm306_vm3, %v303_v41  ;;  %v1464_v45 = vpop.f32.mrf.mxu0  ;;  %v483_v41 = vlaneseq }
 0x1e1   :  { %1480 = vmatprep.mubr.msk.bf16.mxu1 %vm1795_vm1, %v1794_v12 }
 0x1e2   :  { %v351_v46 = vpop.f32.mrf.mxu0  ;;  %v484_v42 = vshrl.u32 %v483_v41, 7 }
 0x1e4   :  { %v1465_v50 = vpop.f32.mrf.mxu0  ;;  %v1985_v44 = vsub.s32 0, %v484_v42 }
 0x1e6   :  { %v354_v58 = vpop.f32.mrf.mxu0 }
 0x2a0   :  { %v1470_v47 = vpop.f32.mrf.mxu1 }
 0x2a1   :  { %v418_v48 = vadd.f32 %v1470_v47, %v1464_v45  ;;  %v479_v47 = vld [vmem:[#allocation10] sm:$0x1] }
 0x2a2   :  { %v409_v49 = vpop.f32.mrf.mxu1 }
 0x2a3   :  { %v410_v52 = vadd.f32 %v409_v49, %v351_v46  ;;  %v433_v56 = vadd.f32 %v1359_v51, %v418_v48 }
 0x2a4   :  { %v1471_v53 = vpop.f32.mrf.mxu1 }
 0x2a5   :  { %v431_v54 = vadd.f32 %v1359_v51, %v410_v52  ;;  %v421_v55 = vadd.f32 %v1471_v53, %v1465_v50  ;;  %v437_v62 = vmax.f32 %v433_v56, 0.0 }
 0x2a6   :  { %v412_v57 = vpop.f32.mrf.mxu1 }
 0x2a7   :  { %v435_v59 = vmax.f32 %v431_v54, 0.0  ;;  %v434_v60 = vadd.f32 %v1359_v51, %v421_v55  ;;  %v413_v61 = vadd.f32 %v412_v57, %v354_v58  ;;  %v455_v3 = vmul.f32 %v437_v62, %v437_v62 }
 0x2a8   :  { %v443_v8 = vsel %vm439_vm4, %v437_v62, 0.0 }
 0x2a9   :  { %v432_v63 = vadd.f32 %v1359_v51, %v413_v61  ;;  %v453_v0 = vmul.f32 %v435_v59, %v435_v59  ;;  %v438_v1 = vmax.f32 %v434_v60, 0.0  ;;  %v440_v4 = vsel %vm439_vm4, %v435_v59, 0.0  ;;  %v1567_v61 = vld [vmem:[%s2109_s8 + $0x8] sm:$0xff]  }
 0x2aa   :  { %v460_v15 = vsel %vm439_vm4, %v455_v3, 0.0 }
 0x2ab   :  { %v436_v2 = vmax.f32 %v432_v63, 0.0  ;;  %v457_v9 = vsel %vm439_vm4, %v453_v0, 0.0  ;;  %v456_v10 = vmul.f32 %v438_v1, %v438_v1  ;;  %v445_v16 = vsel %vm439_vm4, %v438_v1, 0.0 }
 0x2ad   :  { %v441_v5 = vsel %vm439_vm4, %v436_v2, 0.0  ;;  %v454_v6 = vmul.f32 %v436_v2, %v436_v2  ;;  %v462_v19 = vsel %vm439_vm4, %v456_v10, 0.0 }
 0x2ae   :  { %v442_v7 = vadd.f32 %v441_v5, %v440_v4 }
 0x2af   :  { %v458_v11 = vsel %vm439_vm4, %v454_v6, 0.0 }
 0x2b0   :  { %v444_v13 = vadd.f32 %v443_v8, %v442_v7  ;;  %v459_v14 = vadd.f32 %v458_v11, %v457_v9 }
 0x2b2   :  { %v446_v17 = vadd.f32 %v445_v16, %v444_v13  ;;  %v461_v18 = vadd.f32 %v460_v15, %v459_v14 }
 0x2b4   :  { %v447_v20 = vrot.slane %v446_v17, 4  ;;  %v463_v21 = vadd.f32 %v462_v19, %v461_v18  ;;  %v1370_v19 = vld [vmem:[#allocation11] ss:$0 sm:$0xff] }
 0x2b6   :  { %v448_v22 = vadd.f32 %v447_v20, %v446_v17  ;;  %v464_v23 = vrot.slane %v463_v21, 4 }
 0x2b8   :  { %v449_v24 = vrot.slane %v448_v22, 2  ;;  %v465_v25 = vadd.f32 %v464_v23, %v463_v21 }
 0x2ba   :  { %v450_v26 = vadd.f32 %v449_v24, %v448_v22  ;;  %v466_v27 = vrot.slane %v465_v25, 2 }
 0x2bc   :  { %v451_v28 = vrot.slane %v450_v26, 1  ;;  %v467_v29 = vadd.f32 %v466_v27, %v465_v25 }
 0x2be   :  { %v452_v32 = vadd.f32 %v451_v28, %v450_v26  ;;  %v468_v33 = vrot.slane %v467_v29, 1 }
 0x2c0   :  { %v469_v34 = vadd.f32 %v468_v33, %v467_v29  ;;  %v470_v35 = vmul.f32 0.03125, %v452_v32 }
 0x2c2   :  { %v471_v36 = vmul.f32 0.03125, %v469_v34  ;;  %v472_v37 = vmul.f32 %v470_v35, %v470_v35 }
 0x2c4   :  { %v473_v38 = vsub.f32 %v471_v36, %v472_v37 }
 0x2c6   :  { %v474_v39 = vmax.f32 %v473_v38, 0.0 }
 0x2c8   :  { %v476_v40 = vadd.f32 1e-05, %v474_v39 }
 0x2ca   :  { %1588 = vrsqrt.f32 %v476_v40 }
 0x2d7   :  { %v1589_v45 = vpop.eup %1588 }
 0x2d8   :  { %v478_v46 = vmul.f32 %v1589_v45, %v475_v43 }
 0x2da   :  { %v480_v48 = vmul.f32 %v478_v46, %v470_v35  ;;  %v486_v49 = vrot.slane %v478_v46, %v1985_v44 }
 0x2dc   :  { %v481_v50 = vsub.f32 %v479_v47, %v480_v48  ;;  %v489_v51 = vmul.f32 %v486_v49, %v436_v2  ;;  %v488_v52 = vmul.f32 %v486_v49, %v435_v59  ;;  %v490_v54 = vmul.f32 %v486_v49, %v437_v62  ;;  %v1568_v59 = vld [vmem:[%s2109_s8] sm:$0xff]   ;;  %v1569_v62 = vld [vmem:[%s2108_s7 + $0x8] sm:$0xff]  }
 0x2dd   :  { %v491_v55 = vmul.f32 %v486_v49, %v438_v1  ;;  %v1570_v1 = vld [vmem:[%s2108_s7] sm:$0xff]  }
 0x2de   :  { %v496_v53 = vrot.slane %v481_v50, %v1985_v44 }
 0x2e0   :  { %v498_v56 = vadd.f32 %v496_v53, %v488_v52  ;;  %v499_v57 = vadd.f32 %v496_v53, %v489_v51  ;;  %v500_v58 = vadd.f32 %v496_v53, %v490_v54  ;;  %v501_v60 = vadd.f32 %v496_v53, %v491_v55 }
 0x2e2   :  { %v1992_v63 = vpack.c.bf16 %v499_v57, %v498_v56  ;;  %v1994_v0 = vpack.c.bf16 %v501_v60, %v500_v58 }
 0x2e4   :  { %1473 = vmatpush3.bf16.msra.mxu0 %v1992_v63  ;;  %1479 = vmatpush3.bf16.msra.mxu1 %v1994_v0 }
 0x2e5   :  { %1484 = vmatprep.subr.bf16.mxu0 %v1567_v61  ;;  %1492 = vmatprep.subr.bf16.mxu1 %v1569_v62 }
 0x2e7   :  { %1475 = vmatmul.mubr.msk.bf16.vlgmr.msra.gmra.mxu0 %vm171_vm0, %v1958_v31  ;;  %1481 = vmatmul.mubr.msk.bf16.vlgmr.msra.gmra.mxu1 %vm171_vm0, %v1956_v30 }
 0x2e8   :  { %1485 = vmatpush3.bf16.msra.mxu0 %v1567_v61  ;;  %1488 = vmatprep.mubr.msk.bf16.mxu0 %vm439_vm4, %v1992_v63 }
 0x2e9   :  { %1486 = vmatprep.subr.bf16.mxu0 %v1568_v59  ;;  %1493 = vmatpush3.bf16.msra.mxu1 %v1569_v62 }
 0x2ea   :  { %1494 = vmatprep.subr.bf16.mxu1 %v1570_v1 }
 0x2ec   :  { %1487 = vmatpush3.bf16.msra.mxu0 %v1568_v59 }
 0x2ed   :  { %1500 = vmatprep.subr.bf16.mxu0 %v1794_v12  ;;  %1495 = vmatpush3.bf16.msra.mxu1 %v1570_v1 }
 0x2ee   :  { %1506 = vmatprep.subr.bf16.mxu1 %v1794_v12 }
 0x2ef   :  { %1489 = vmatmul.mubr.msk.bf16.vlgmr.msra.gmra.mxu0 %vm439_vm4, %v1994_v0 }
 0x2f0   :  { %1502 = vmatprep.mubr.msk.bf16.mxu0 %vm1795_vm1, %v1794_v12 }
 0x3a7   :  { %v538_v2 = vpop.f32.mrf.mxu0  ;;  %v579_v3 = vpop.f32.mrf.mxu1 }
 0x3a9   :  { %v1476_v4 = vpop.f32.mrf.mxu0  ;;  %v1482_v5 = vpop.f32.mrf.mxu1 }
 0x3ab   :  { %v541_v6 = vpop.f32.mrf.mxu0  ;;  %v582_v7 = vpop.f32.mrf.mxu1 }
 0x3ac   :  { %v586_v8 = vpack.c.bf16 %v541_v6, %v538_v2  ;;  %v587_v9 = vpack.c.bf16 %v582_v7, %v579_v3 }
 0x3ad   :  { %v1477_v10 = vpop.f32.mrf.mxu0  ;;  %v1483_v11 = vpop.f32.mrf.mxu1 }
 0x3ae   :  { %1496 = vmatprep.mubr.msk.bf16.mxu1 %vm439_vm4, %v586_v8  ;;  %v780_v10 = vld [vmem:[#allocation13] sm:$0x1] }
 0x3af   :  { %1497 = vmatmul.mubr.msk.bf16.vlgmr.msra.gmra.mxu1 %vm439_vm4, %v587_v9  ;;  %v1490_v13 = vpop.f32.mrf.mxu0 }
 0x3b0   :  { %1508 = vmatprep.mubr.msk.bf16.mxu1 %vm1795_vm1, %v1794_v12 }
 0x3b1   :  { %v648_v14 = vpop.f32.mrf.mxu0 }
 0x3b3   :  { %v1491_v18 = vpop.f32.mrf.mxu0 }
 0x3b5   :  { %v651_v26 = vpop.f32.mrf.mxu0 }
 0x46f   :  { %v1498_v15 = vpop.f32.mrf.mxu1 }
 0x470   :  { %v724_v16 = vadd.f32 %v1498_v15, %v1490_v13 }
 0x471   :  { %v715_v17 = vpop.f32.mrf.mxu1 }
 0x472   :  { %v716_v20 = vadd.f32 %v715_v17, %v648_v14  ;;  %v739_v24 = vadd.f32 %v1370_v19, %v724_v16  ;;  %v784_v14 = vld [vmem:[#allocation14] sm:$0x1] }
 0x473   :  { %v1499_v21 = vpop.f32.mrf.mxu1 }
 0x474   :  { %v737_v22 = vadd.f32 %v1370_v19, %v716_v20  ;;  %v727_v23 = vadd.f32 %v1499_v21, %v1491_v18  ;;  %v743_v32 = vmax.f32 %v739_v24, 0.0 }
 0x475   :  { %v718_v25 = vpop.f32.mrf.mxu1 }
 0x476   :  { %v741_v27 = vmax.f32 %v737_v22, 0.0  ;;  %v740_v28 = vadd.f32 %v1370_v19, %v727_v23  ;;  %v719_v29 = vadd.f32 %v718_v25, %v651_v26  ;;  %v760_v36 = vmul.f32 %v743_v32, %v743_v32 }
 0x477   :  { %v748_v41 = vsel %vm439_vm4, %v743_v32, 0.0 }
 0x478   :  { %v738_v33 = vadd.f32 %v1370_v19, %v719_v29  ;;  %v758_v12 = vmul.f32 %v741_v27, %v741_v27  ;;  %v744_v34 = vmax.f32 %v740_v28, 0.0  ;;  %v745_v37 = vsel %vm439_vm4, %v741_v27, 0.0  ;;  %v1571_v28 = vld [vmem:[%s2114_s13 + $0x8] sm:$0xff]  }
 0x479   :  { %v765_v48 = vsel %vm439_vm4, %v760_v36, 0.0 }
 0x47a   :  { %v742_v35 = vmax.f32 %v738_v33, 0.0  ;;  %v762_v42 = vsel %vm439_vm4, %v758_v12, 0.0  ;;  %v761_v43 = vmul.f32 %v744_v34, %v744_v34  ;;  %v750_v49 = vsel %vm439_vm4, %v744_v34, 0.0  ;;  %v1574_v12 = vld [vmem:[%s2119_s18] sm:$0xff]  }
 0x47c   :  { %v746_v38 = vsel %vm439_vm4, %v742_v35, 0.0  ;;  %v759_v39 = vmul.f32 %v742_v35, %v742_v35  ;;  %v767_v52 = vsel %vm439_vm4, %v761_v43, 0.0 }
 0x47d   :  { %v747_v40 = vadd.f32 %v746_v38, %v745_v37 }
 0x47e   :  { %v763_v45 = vsel %vm439_vm4, %v759_v39, 0.0 }
 0x47f   :  { %v749_v46 = vadd.f32 %v748_v41, %v747_v40  ;;  %v764_v47 = vadd.f32 %v763_v45, %v762_v42 }
 0x481   :  { %v751_v50 = vadd.f32 %v750_v49, %v749_v46  ;;  %v766_v51 = vadd.f32 %v765_v48, %v764_v47  ;;  %v1578_v46 = vld [vmem:[%s2118_s17] sm:$0xff]  }
 0x482   :  { %v1579_v47 = vld [vmem:[%s2120_s19] sm:$0xff]  }
 0x483   :  { %v752_v53 = vrot.slane %v751_v50, 4  ;;  %v768_v54 = vadd.f32 %v767_v52, %v766_v51 }
 0x485   :  { %v753_v55 = vadd.f32 %v752_v53, %v751_v50  ;;  %v769_v56 = vrot.slane %v768_v54, 4 }
 0x487   :  { %v754_v57 = vrot.slane %v753_v55, 2  ;;  %v770_v58 = vadd.f32 %v769_v56, %v768_v54 }
 0x489   :  { %v755_v60 = vadd.f32 %v754_v57, %v753_v55  ;;  %v771_v61 = vrot.slane %v770_v58, 2 }
 0x48b   :  { %v756_v59 = vrot.slane %v755_v60, 1  ;;  %v772_v62 = vadd.f32 %v771_v61, %v770_v58 }
 0x48d   :  { %v757_v1 = vadd.f32 %v756_v59, %v755_v60  ;;  %v773_v2 = vrot.slane %v772_v62, 1 }
 0x48f   :  { %v774_v3 = vadd.f32 %v773_v2, %v772_v62  ;;  %v775_v4 = vmul.f32 0.03125, %v757_v1 }
 0x491   :  { %v776_v5 = vmul.f32 0.03125, %v774_v3  ;;  %v777_v6 = vmul.f32 %v775_v4, %v775_v4 }
 0x493   :  { %v778_v7 = vsub.f32 %v776_v5, %v777_v6 }
 0x495   :  { %v779_v8 = vmax.f32 %v778_v7, 0.0 }
 0x497   :  { %v781_v9 = vadd.f32 1e-05, %v779_v8 }
 0x499   :  { %1590 = vrsqrt.f32 %v781_v9 }
 0x4a6   :  { %v1591_v11 = vpop.eup %1590 }
 0x4a7   :  { %v783_v13 = vmul.f32 %v1591_v11, %v780_v10 }
 0x4a9   :  { %v785_v15 = vmul.f32 %v783_v13, %v775_v4  ;;  %v791_v16 = vrot.slane %v783_v13, %v1985_v44 }
 0x4ab   :  { %v786_v17 = vsub.f32 %v784_v14, %v785_v15  ;;  %v794_v18 = vmul.f32 %v791_v16, %v742_v35  ;;  %v793_v19 = vmul.f32 %v791_v16, %v741_v27  ;;  %v795_v21 = vmul.f32 %v791_v16, %v743_v32  ;;  %v1572_v27 = vld [vmem:[%s2114_s13] sm:$0xff]   ;;  %v1573_v32 = vld [vmem:[%s2119_s18 + $0x8] sm:$0xff]  }
 0x4ac   :  { %v796_v22 = vmul.f32 %v791_v16, %v744_v34  ;;  %v1577_v34 = vld [vmem:[%s2118_s17 + $0x8] sm:$0xff]  }
 0x4ad   :  { %v801_v20 = vrot.slane %v786_v17, %v1985_v44 }
 0x4af   :  { %v803_v23 = vadd.f32 %v801_v20, %v793_v19  ;;  %v804_v24 = vadd.f32 %v801_v20, %v794_v18  ;;  %v805_v25 = vadd.f32 %v801_v20, %v795_v21  ;;  %v806_v26 = vadd.f32 %v801_v20, %v796_v22 }
 0x4b1   :  { %v807_v29 = vpack.c.bf16 %v804_v24, %v803_v23  ;;  %v808_v33 = vpack.c.bf16 %v806_v26, %v805_v25 }
 0x4b3   :  { %1501 = vmatpush3.bf16.msra.mxu0 %v807_v29  ;;  %1507 = vmatpush3.bf16.msra.mxu1 %v808_v33 }
 0x4b4   :  { %1512 = vmatprep.subr.bf16.mxu0 %v1571_v28 }
 0x4b6   :  { %1503 = vmatmul.mubr.msk.bf16.vlgmr.msra.gmra.mxu0 %vm171_vm0, %v1958_v31  ;;  %1509 = vmatmul.mubr.msk.bf16.vlgmr.msra.gmra.mxu1 %vm171_vm0, %v1956_v30  ;;  %v1575_v30 = vld [vmem:[%s2113_s12 + $0x8] sm:$0xff]   ;;  %v1576_v31 = vld [vmem:[%s2113_s12] sm:$0xff]  }
 0x4b7   :  { %1513 = vmatpush3.bf16.msra.mxu0 %v1571_v28  ;;  %1516 = vmatprep.mubr.msk.bf16.mxu0 %vm439_vm4, %v807_v29 }
 0x4b8   :  { %1514 = vmatprep.subr.bf16.mxu0 %v1572_v27  ;;  %1520 = vmatprep.subr.bf16.mxu1 %v1575_v30 }
 0x4b9   :  { %1521 = vmatpush3.bf16.msra.mxu1 %v1575_v30 }
 0x4ba   :  { %1522 = vmatprep.subr.bf16.mxu1 %v1576_v31 }
 0x4bb   :  { %1515 = vmatpush3.bf16.msra.mxu0 %v1572_v27 }
 0x4bc   :  { %1528 = vmatprep.subr.bf16.mxu0 %v1573_v32 }
 0x4bd   :  { %1523 = vmatpush3.bf16.msra.mxu1 %v1576_v31 }
 0x4be   :  { %1517 = vmatmul.mubr.msk.bf16.vlgmr.msra.gmra.mxu0 %vm439_vm4, %v808_v33  ;;  %1536 = vmatprep.subr.bf16.mxu1 %v1577_v34 }
 0x4bf   :  { %1529 = vmatpush3.bf16.msra.mxu0 %v1573_v32  ;;  %1532 = vmatprep.mubr.msk.bf16.mxu0 %vm439_vm4, %v807_v29 }
 0x4c0   :  { %1530 = vmatprep.subr.bf16.mxu0 %v1574_v12 }
 0x4c3   :  { %1531 = vmatpush3.bf16.msra.mxu0 %v1574_v12 }
 0x4c4   :  { %1544 = vmatprep.subr.bf16.mxu0 %v1579_v47 }
 0x4c6   :  { %1533 = vmatmul.mubr.msk.bf16.vlgmr.msra.gmra.mxu0 %vm439_vm4, %v808_v33 }
 0x4c7   :  { %1545 = vmatpush3.bf16.msra.mxu0 %v1579_v47 }
 0x576   :  { %v843_v35 = vpop.f32.mrf.mxu0  ;;  %v884_v36 = vpop.f32.mrf.mxu1 }
 0x578   :  { %v1504_v37 = vpop.f32.mrf.mxu0  ;;  %v1510_v38 = vpop.f32.mrf.mxu1 }
 0x57a   :  { %v846_v39 = vpop.f32.mrf.mxu0  ;;  %v887_v40 = vpop.f32.mrf.mxu1 }
 0x57b   :  { %v891_v41 = vpack.c.bf16 %v846_v39, %v843_v35  ;;  %v892_v42 = vpack.c.bf16 %v887_v40, %v884_v36 }
 0x57c   :  { %v1505_v43 = vpop.f32.mrf.mxu0  ;;  %v1511_v45 = vpop.f32.mrf.mxu1 }
 0x57d   :  { %1524 = vmatprep.mubr.msk.bf16.mxu1 %vm439_vm4, %v891_v41  ;;  %v1085_v41 = vld [vmem:[%s2116_s15] sm:$0x1] }
 0x57e   :  { %1525 = vmatmul.mubr.msk.bf16.vlgmr.msra.gmra.mxu1 %vm439_vm4, %v892_v42  ;;  %v1518_v48 = vpop.f32.mrf.mxu0  ;;  %v1089_v45 = vld [vmem:[%s2117_s16] sm:$0x1] }
 0x57f   :  { %1537 = vmatpush3.bf16.msra.mxu1 %v1577_v34  ;;  %1540 = vmatprep.mubr.msk.bf16.mxu1 %vm439_vm4, %v1992_v63  ;;  %v1381_v63 = vld [vmem:[%s2115_s14] ss:$0 sm:$0xff] }
 0x580   :  { %1538 = vmatprep.subr.bf16.mxu1 %v1578_v46  ;;  %v953_v49 = vpop.f32.mrf.mxu0 }
 0x582   :  { %v1519_v53 = vpop.f32.mrf.mxu0 }
 0x583   :  { %1539 = vmatpush3.bf16.msra.mxu1 %v1578_v46 }
 0x584   :  { %v956_v60 = vpop.f32.mrf.mxu0 }
 0x586   :  { %1541 = vmatmul.mubr.msk.bf16.vlgmr.msra.gmra.mxu1 %vm439_vm4, %v1994_v0 }
 0x63e   :  { %v1526_v50 = vpop.f32.mrf.mxu1 }
 0x63f   :  { %v1029_v51 = vadd.f32 %v1526_v50, %v1518_v48 }
 0x640   :  { %v1020_v52 = vpop.f32.mrf.mxu1 }
 0x641   :  { %v1021_v54 = vadd.f32 %v1020_v52, %v953_v49  ;;  %v1044_v57 = vadd.f32 %v1381_v63, %v1029_v51 }
 0x642   :  { %v1527_v55 = vpop.f32.mrf.mxu1 }
 0x643   :  { %v1042_v56 = vadd.f32 %v1381_v63, %v1021_v54  ;;  %v1032_v0 = vadd.f32 %v1527_v55, %v1519_v53  ;;  %v1048_v1 = vmax.f32 %v1044_v57, 0.0 }
 0x644   :  { %v1023_v58 = vpop.f32.mrf.mxu1 }
 0x645   :  { %v1046_v61 = vmax.f32 %v1042_v56, 0.0  ;;  %v1045_v59 = vadd.f32 %v1381_v63, %v1032_v0  ;;  %v1024_v62 = vadd.f32 %v1023_v58, %v956_v60  ;;  %v1065_v6 = vmul.f32 %v1048_v1, %v1048_v1  ;;  %v1534_v58 = vpop.f32.mrf.mxu0 }
 0x646   :  { %v1053_v11 = vsel %vm171_vm0, %v1048_v1, 0.0 }
 0x647   :  { %v1043_v2 = vadd.f32 %v1381_v63, %v1024_v62  ;;  %v1063_v3 = vmul.f32 %v1046_v61, %v1046_v61  ;;  %v1049_v4 = vmax.f32 %v1045_v59, 0.0  ;;  %v1050_v7 = vsel %vm171_vm0, %v1046_v61, 0.0  ;;  %v1168_v60 = vpop.f32.mrf.mxu0  ;;  %v1542_v59 = vpop.f32.mrf.mxu1 }
 0x648   :  { %v1070_v18 = vsel %vm171_vm0, %v1065_v6, 0.0 }
 0x649   :  { %v1047_v5 = vmax.f32 %v1043_v2, 0.0  ;;  %v1067_v13 = vsel %vm171_vm0, %v1063_v3, 0.0  ;;  %v1066_v14 = vmul.f32 %v1049_v4, %v1049_v4  ;;  %v1055_v19 = vsel %vm171_vm0, %v1049_v4, 0.0  ;;  %v1535_v62 = vpop.f32.mrf.mxu0  ;;  %v1229_v2 = vpop.f32.mrf.mxu1 }
 0x64b   :  { %v1051_v8 = vsel %vm171_vm0, %v1047_v5, 0.0  ;;  %v1064_v9 = vmul.f32 %v1047_v5, %v1047_v5  ;;  %v1072_v22 = vsel %vm171_vm0, %v1066_v14, 0.0  ;;  %v1543_v3 = vpop.f32.mrf.mxu1 }
 0x64c   :  { %v1052_v10 = vadd.f32 %v1051_v8, %v1050_v7 }
 0x64d   :  { %v1068_v15 = vsel %vm171_vm0, %v1064_v9, 0.0  ;;  %v1232_v7 = vpop.f32.mrf.mxu1  ;;  %v1241_v9 = vadd.f32 %v1543_v3, %v1535_v62 }
 0x64e   :  { %v1054_v16 = vadd.f32 %v1053_v11, %v1052_v10  ;;  %v1069_v17 = vadd.f32 %v1068_v15, %v1067_v13 }
 0x650   :  { %v1056_v20 = vadd.f32 %v1055_v19, %v1054_v16  ;;  %v1071_v21 = vadd.f32 %v1070_v18, %v1069_v17 }
 0x652   :  { %v1057_v23 = vrot.slane %v1056_v20, 4  ;;  %v1073_v24 = vadd.f32 %v1072_v22, %v1071_v21 }
 0x654   :  { %v1058_v25 = vadd.f32 %v1057_v23, %v1056_v20  ;;  %v1074_v26 = vrot.slane %v1073_v24, 4 }
 0x656   :  { %v1059_v28 = vrot.slane %v1058_v25, 2  ;;  %v1075_v29 = vadd.f32 %v1074_v26, %v1073_v24 }
 0x658   :  { %v1060_v33 = vadd.f32 %v1059_v28, %v1058_v25  ;;  %v1076_v27 = vrot.slane %v1075_v29, 2 }
 0x65a   :  { %v1061_v32 = vrot.slane %v1060_v33, 1  ;;  %v1077_v12 = vadd.f32 %v1076_v27, %v1075_v29 }
 0x65c   :  { %v1062_v30 = vadd.f32 %v1061_v32, %v1060_v33  ;;  %v1078_v31 = vrot.slane %v1077_v12, 1 }
 0x65e   :  { %v1079_v34 = vadd.f32 %v1078_v31, %v1077_v12  ;;  %v1080_v35 = vmul.f32 0.03125, %v1062_v30 }
 0x660   :  { %v1081_v36 = vmul.f32 0.03125, %v1079_v34  ;;  %v1082_v37 = vmul.f32 %v1080_v35, %v1080_v35 }
 0x662   :  { %v1083_v38 = vsub.f32 %v1081_v36, %v1082_v37 }
 0x664   :  { %v1084_v39 = vmax.f32 %v1083_v38, 0.0 }
 0x666   :  { %v1086_v40 = vadd.f32 1e-05, %v1084_v39 }
 0x668   :  { %1592 = vrsqrt.f32 %v1086_v40 }
 0x675   :  { %v1593_v42 = vpop.eup %1592 }
 0x676   :  { %v1088_v43 = vmul.f32 %v1593_v42, %v1085_v41 }
 0x678   :  { %v1090_v46 = vmul.f32 %v1088_v43, %v1080_v35  ;;  %v1096_v47 = vrot.slane %v1088_v43, %v1985_v44 }
 0x67a   :  { %v1091_v48 = vsub.f32 %v1089_v45, %v1090_v46  ;;  %v1099_v49 = vmul.f32 %v1096_v47, %v1047_v5  ;;  %v1098_v50 = vmul.f32 %v1096_v47, %v1046_v61  ;;  %v1100_v52 = vmul.f32 %v1096_v47, %v1048_v1  ;;  %v1171_v61 = vpop.f32.mrf.mxu0 }
 0x67b   :  { %v1101_v53 = vmul.f32 %v1096_v47, %v1049_v4  ;;  %v1393_v4 = vld [vmem:[%s2121_s20] ss:$0 sm:$0xff]  ;;  %v1230_v5 = vadd.f32 %v1229_v2, %v1168_v60  ;;  %v1233_v14 = vadd.f32 %v1232_v7, %v1171_v61  ;;  %s1754_s20 = scalar_lea.vmem %s1336_s24, 512 }
 0x67c   :  { %v1106_v51 = vrot.slane %v1091_v48, %v1985_v44  ;;  %v1238_v44 = vadd.f32 %v1542_v59, %v1534_v58  ;;  %p1755_p12 = scmp.ne.s32.totalorder %s1336_s24, %s1754_s20  ;;  %p1760_p0 = scmp.lt.s32.totalorder %s1754_s20, %s1754_s20 }
 0x67e   :  { %v1108_v63 = vadd.f32 %v1106_v51, %v1098_v50  ;;  %v1109_v54 = vadd.f32 %v1106_v51, %v1099_v49  ;;  %v1110_v55 = vadd.f32 %v1106_v51, %v1100_v52  ;;  %v1111_v56 = vadd.f32 %v1106_v51, %v1101_v53  ;;  %p1761_p1 = por %p1760_p0, %p1759_p13 }
 0x680   :  { %v1112_v0 = vpack.c.bf16 %v1109_v54, %v1108_v63  ;;  %v1113_v57 = vpack.c.bf16 %v1111_v56, %v1110_v55  ;;  %p1762_p2 = pnand %p1761_p1, %p1755_p12 }
 0x682   :  { %1546 = vmatprep.mubr.msk.bf16.mxu0 %vm171_vm0, %v1112_v0 }
 0x683   :  { %1547 = vmatmul.mubr.msk.bf16.vlgmr.msra.gmra.mxu0 %vm171_vm0, %v1113_v57 }
 0x743   :  { %v1548_v1 = vpop.f32.mrf.mxu0 }
 0x744   :  { %v1309_v6 = vadd.f32 %v1548_v1, %v1238_v44 }
 0x745   :  { %v1292_v8 = vpop.f32.mrf.mxu0 }
 0x746   :  { %v1320_v10 = vadd.f32 %v1393_v4, %v1309_v6  ;;  %v1307_v11 = vadd.f32 %v1292_v8, %v1230_v5 }
 0x747   :  { %v1549_v13 = vpop.f32.mrf.mxu0 }
 0x748   :  { %v1324_v15 = vmax.f32 %v1320_v10, 0.0  ;;  %v1318_v16 = vadd.f32 %v1393_v4, %v1307_v11  ;;  %v1310_v17 = vadd.f32 %v1549_v13, %v1241_v9 }
 0x749   :  { %v1295_v18 = vpop.f32.mrf.mxu0 }
 0x74a   :  { %1328 = vst [vmem:[#allocation16 + $0x10] sm:$0xff] %v1324_v15  ;;  %v1322_v19 = vmax.f32 %v1318_v16, 0.0  ;;  %v1321_v20 = vadd.f32 %v1393_v4, %v1310_v17  ;;  %v1308_v21 = vadd.f32 %v1295_v18, %v1233_v14 }
 0x74c   :  { %1326 = vst [vmem:[#allocation16] sm:$0xff] %v1322_v19  ;;  %v1325_v22 = vmax.f32 %v1321_v20, 0.0  ;;  %v1319_v23 = vadd.f32 %v1393_v4, %v1308_v21 }
 0x74e   :  { %1329 = vst [vmem:[#allocation16 + $0x18] sm:$0xff] %v1325_v22  ;;  %v1323_v24 = vmax.f32 %v1319_v23, 0.0 }
 0x750   :  { %1327 = vst [vmem:[#allocation16 + $0x8] sm:$0xff] %v1323_v24 }
 0x751   :  { %1765 = shalt.err (!%p1762_p2)
}
 0x752   :  { %s1797_s6 = smov 128   ;;  %s1798_s7 = smov 8  }
 0x753   :  { %1341 = dma.vmem_to_hbm [thread:$0]  %s1336_s24, 512, %s2122_s21, [#allocation4], %s1797_s6, %s1797_s6, %s1798_s7  }
 0x754   :  { %1784 = dma.done.wait [#allocation4], 512  }
 0x755   :  { %1785 = vsyncadd [#allocation4], 4294966784 }
 0x756   :  { %1345 = vsyncpa [#allocation3], 1 }
 0x757   :  { %1346 = vsyncpa [#allocation6], 1 }
 0x758   :  { %1347 = vsyncpa [#allocation9], 1 }
 0x759   :  { %1348 = vsyncpa [#allocation12], 1 }
 0x75a   :  { %1349 = vsyncpa [#allocation15], 1 }
 0x75b   :  { %1350 = vsyncpa [#allocation4], 1 }

</bundles_post_ra>
